<compile_context>
chip_gen: v5e
topology: v5e:2x2
jax: 0.10.0
libtpu: 0.0.40
codegen_flags: <defaults>
</compile_context>

<pallas_src>
import jax
import jax.numpy as jnp
from jax import lax
from jax.experimental import pallas as pl
from jax.experimental.pallas import tpu as pltpu

EPS = 1e-5  # nn.BatchNorm2d default eps


def _round_up(x, m):
    return (x + m - 1) // m * m


def _cdiv(a, b):
    return (a + b - 1) // b


def _vmem_capacity_bytes():
    try:
        return int(pltpu.get_tpu_info().vmem_capacity_bytes)
    except Exception:
        return 64 * 1024 * 1024  # conservative fallback (v7x per-core VMEM)


# ---------------------------------------------------------------------------
# Pass A: tiled MXU matmul (bf16 patches @ bf16 weights -> f32 scratch) with a
# K-reduction axis, bf16 conv writeback and per-channel sum / sum-of-squares
# accumulation for the BatchNorm batch statistics.
# ---------------------------------------------------------------------------
def _conv_stats_kernel(p_ref, w_ref, conv_ref, sum_ref, sq_ref, acc_ref):
    i = pl.program_id(1)
    k = pl.program_id(2)
    nk = pl.num_programs(2)

    # Zero this parallel slice's resident stat accumulators on its first step.
    @pl.when((i == 0) & (k == 0))
    def _():
        sum_ref[...] = jnp.zeros_like(sum_ref)
        sq_ref[...] = jnp.zeros_like(sq_ref)

    # Zero the f32 conv accumulator at the start of every K reduction.
    @pl.when(k == 0)
    def _():
        acc_ref[...] = jnp.zeros_like(acc_ref)

    # bf16 operands, f32 accumulation on the MXU.
    acc_ref[...] += jnp.dot(p_ref[...], w_ref[...], preferred_element_type=jnp.float32)

    # On the last K step: write the bf16 conv tile and accumulate BN statistics
    # from the *f32* accumulator (before the downcast).  Padded rows/columns are
    # all-zero so they contribute exactly zero to the sums -> no masking needed.
    @pl.when(k == nk - 1)
    def _():
        acc = acc_ref[...]
        conv_ref[...] = acc.astype(conv_ref.dtype)
        tm, cp = acc.shape
        # Partial reduce to 8 sublanes (pure VPU adds, no per-tile cross-sublane
        # XLU reduce); the final 8->1 reduction is done in the JAX finalize.
        sum_ref[...] += acc.reshape(tm // 8, 8, cp).sum(axis=0)
        sq_ref[...] += (acc * acc).reshape(tm // 8, 8, cp).sum(axis=0)


# ---------------------------------------------------------------------------
# Pass B: normalize each bf16 conv tile with the *global* mean / inv-std, ReLU.
# ---------------------------------------------------------------------------
def _bn_relu_kernel(conv_ref, mean_ref, inv_ref, o_ref):
    x = conv_ref[...].astype(jnp.float32)
    y = (x - mean_ref[0:1, :]) * inv_ref[0:1, :]
    o_ref[...] = jnp.maximum(y, 0.0).astype(o_ref.dtype)


def conv_bn_forward(x_nchw, weight_oihw, stride, dilation=1, *, tm=2048,
                    out_layout="NCHW"):
    """Forward pass of `conv_bn`: conv ("same" padding) -> BN (batch stats) -> ReLU."""
    N, Cin, H, W = x_nchw.shape
    Cout, Cin2, KH, KW = weight_oihw.shape
    assert Cin == Cin2

    # "Same" padding arithmetic (matches nn.Conv2d(padding='same') and Conv2dSame).
    OH = (H + stride - 1) // stride
    OW = (W + stride - 1) // stride
    pad_h = max(0, (OH - 1) * stride + (KH - 1) * dilation + 1 - H)
    pad_w = max(0, (OW - 1) * stride + (KW - 1) * dilation + 1 - W)
    ph0, ph1 = pad_h // 2, pad_h - pad_h // 2
    pw0, pw1 = pad_w // 2, pad_w - pad_w // 2

    # NCHW -> NHWC, cast to bf16 early (halves im2col HBM traffic), zero-pad spatially.
    x_nhwc = jnp.transpose(x_nchw, (0, 2, 3, 1)).astype(jnp.bfloat16)
    xp = jnp.pad(x_nhwc, ((0, 0), (ph0, ph1), (pw0, pw1), (0, 0)))

    # im2col (XLA glue): (N, OH, OW, KH*KW, Cin) -> (M, K), in bf16.
    # TODO(synk): for stride==1 the KH*KW duplication could be removed with a (kh, kw)
    # reduction grid axis reading shifted windows of the padded NHWC input directly;
    # the materialized path is kept here (it is needed anyway for stride > 1).
    cols = []
    for kh in range(KH):
        for kw in range(KW):
            h0 = kh * dilation
            w0 = kw * dilation
            sl = xp[:, h0: h0 + (OH - 1) * stride + 1: stride,
                       w0: w0 + (OW - 1) * stride + 1: stride, :]
            cols.append(sl)
    patches = jnp.stack(cols, axis=3)
    M = N * OH * OW
    K = KH * KW * Cin
    patches = patches.reshape(M, K)

    # Weight (Cout, Cin, KH, KW) -> (K, Cout) in bf16; K ordering matches the im2col
    # ordering (kh*KW + kw)*Cin + cin.
    w_mat = jnp.transpose(weight_oihw, (2, 3, 1, 0)).reshape(K, Cout).astype(jnp.bfloat16)

    # ---- Generation-aware tiling (v5e/v6e: 128 MiB VMEM, v7x: 64 MiB). ------------
    vmem_cap = _vmem_capacity_bytes()
    budget = int(vmem_cap * 0.45)            # per-pallas_call VMEM working-set budget

    Cp = _round_up(Cout, 128)
    Kp = _round_up(K, 128)
    if Kp > 1024:                            # tile the contraction axis for large K
        TK = 1024 if budget >= (24 << 20) else 512
        Kp = _round_up(Kp, TK)
    else:
        TK = Kp
    n_k = Kp // TK

    # Per-step footprint(TM) ~ patches (2x dbuf, bf16) + weights (2x, bf16)
    #                        + conv out (2x, bf16) + f32 scratch + tiny stats.
    fixed = 4 * TK * Cp + 8 * 8 * Cp * 4
    per_tm = 4 * TK + 4 * Cp + 4 * Cp
    tm_budget = max(256, (budget - fixed) // per_tm)
    TM = max(128, min(tm, tm_budget) // 128 * 128)
    TM = min(TM, _round_up(M, 16))           # bf16 sublane packing -> multiple of 16

    n_m_total = _cdiv(M, TM)
    n_par = 2 if n_m_total >= 2 else 1       # feed both v7x TensorCores
    n_mi = _cdiv(n_m_total, n_par)
    Mp = n_par * n_mi * TM

    pass_a_bytes = (4 * TM * TK) + (4 * TK * Cp) + (4 * TM * Cp) + (4 * TM * Cp) \
        + 8 * 8 * Cp * 4
    vmem_limit = int(min(0.85 * vmem_cap,
                         max(32 << 20, pass_a_bytes * 3 // 2 + (4 << 20))))

    # Zeros do not change the matmul, and padded rows / columns contribute zero to
    # the BN sums (the finalize divides by the true M).
    patches_p = jnp.pad(patches, ((0, Mp - M), (0, Kp - K)))
    w_p = jnp.pad(w_mat, ((0, Kp - K), (0, Cp - Cout)))

    cost_a = pl.CostEstimate(
        flops=int(2 * M * K * Cout),
        transcendentals=0,
        bytes_accessed=int(Mp * Kp * 2 + n_par * n_mi * Kp * Cp * 2 + Mp * Cp * 2))

    conv_bf16, sum_acc, sq_acc = pl.pallas_call(
        _conv_stats_kernel,
        out_shape=(jax.ShapeDtypeStruct((Mp, Cp), jnp.bfloat16),
                   jax.ShapeDtypeStruct((n_par * 8, Cp), jnp.float32),
                   jax.ShapeDtypeStruct((n_par * 8, Cp), jnp.float32)),
        grid=(n_par, n_mi, n_k),
        in_specs=[
            pl.BlockSpec((TM, TK), lambda p, i, k: (p * n_mi + i, k)),
            pl.BlockSpec((TK, Cp), lambda p, i, k: (k, 0)),
        ],
        out_specs=(
            pl.BlockSpec((TM, Cp), lambda p, i, k: (p * n_mi + i, 0)),
            pl.BlockSpec((8, Cp), lambda p, i, k: (p, 0)),   # per-slice accumulator
            pl.BlockSpec((8, Cp), lambda p, i, k: (p, 0)),   # per-slice accumulator
        ),
        scratch_shapes=[pltpu.VMEM((TM, Cp), jnp.float32)],
        compiler_params=pltpu.CompilerParams(
            dimension_semantics=("parallel", "arbitrary", "arbitrary"),
            vmem_limit_bytes=vmem_limit),
        cost_estimate=cost_a,
    )(patches_p, w_p)

    # Finalize the *global* batch statistics (tiny O(Cout) work -> plain JAX).
    # NOTE: E[x^2]-E[x]^2 in f32 can cancel when |mean| >> std; acceptable for conv
    # activations at these sizes, a shifted formulation would be safer in that regime.
    cnt = jnp.float32(M)
    mean = jnp.sum(sum_acc, axis=0) / cnt
    var = jnp.maximum(jnp.sum(sq_acc, axis=0) / cnt - mean * mean, 0.0)  # biased var
    inv_std = lax.rsqrt(var + EPS)
    mean_b = jnp.broadcast_to(mean[None, :], (8, Cp))
    inv_b = jnp.broadcast_to(inv_std[None, :], (8, Cp))

    n_b = Mp // TM
    cost_b = pl.CostEstimate(
        flops=int(2 * Mp * Cp),
        transcendentals=0,
        bytes_accessed=int(Mp * Cp * 2 + Mp * Cp * 4))

    out_p = pl.pallas_call(
        _bn_relu_kernel,
        out_shape=jax.ShapeDtypeStruct((Mp, Cp), jnp.float32),
        grid=(n_b,),
        in_specs=[
            pl.BlockSpec((TM, Cp), lambda i: (i, 0)),
            pl.BlockSpec((8, Cp), lambda i: (0, 0)),
            pl.BlockSpec((8, Cp), lambda i: (0, 0)),
        ],
        out_specs=pl.BlockSpec((TM, Cp), lambda i: (i, 0)),
        compiler_params=pltpu.CompilerParams(
            dimension_semantics=("parallel",),
            vmem_limit_bytes=vmem_limit),
        cost_estimate=cost_b,
    )(conv_bf16, mean_b, inv_b)

    out = out_p[:M, :Cout].reshape(N, OH, OW, Cout).astype(x_nchw.dtype)
    if out_layout == "NHWC":
        return out  # skip the HBM round-trip of the layout transpose when allowed
    # TODO(synk): the NCHW transpose could be folded into Pass B via (Cp, TM) output
    # blocks + an in-kernel XLU transpose; kept as XLA glue here.
    return jnp.transpose(out, (0, 3, 1, 2))

    # TODO(synk): BatchNorm running_mean/running_var buffer updates (momentum=0.01)
    # are training-time side effects and are not reproduced (they don't affect output).


def _reference_conv_bn(x_nchw, weight_oihw, stride, dilation=1):
    """Pure-JAX reference (XLA conv, f32) for validation."""
    N, Cin, H, W = x_nchw.shape
    Cout, _, KH, KW = weight_oihw.shape
    OH = (H + stride - 1) // stride
    OW = (W + stride - 1) // stride
    pad_h = max(0, (OH - 1) * stride + (KH - 1) * dilation + 1 - H)
    pad_w = max(0, (OW - 1) * stride + (KW - 1) * dilation + 1 - W)
    padding = ((pad_h // 2, pad_h - pad_h // 2), (pad_w // 2, pad_w - pad_w // 2))
    conv = lax.conv_general_dilated(
        x_nchw.astype(jnp.float32), weight_oihw.astype(jnp.float32),
        window_strides=(stride, stride), padding=padding,
        rhs_dilation=(dilation, dilation),
        dimension_numbers=("NCHW", "OIHW", "NCHW"))
    mean = conv.mean(axis=(0, 2, 3), keepdims=True)
    var = ((conv - mean) ** 2).mean(axis=(0, 2, 3), keepdims=True)
    return jnp.maximum((conv - mean) * lax.rsqrt(var + EPS), 0.0)


if __name__ == "__main__":
    key = jax.random.PRNGKey(0)
    kx, kw = jax.random.split(key)

    # conv_bn(kernel_size=3, in_channels=4, out_channels=8, stride=2, bias=False)
    N, Cin, H, W = 2, 4, 16, 16
    Cout, ksize, stride = 8, 3, 2

    x = jax.random.normal(kx, (N, Cin, H, W), dtype=jnp.float32)
    fan_in = Cin * ksize * ksize
    bound = 1.0 / (fan_in ** 0.5)  # deterministic Conv2d-style uniform init
    weight = jax.random.uniform(kw, (Cout, Cin, ksize, ksize),
                                dtype=jnp.float32, minval=-bound, maxval=bound)

    out = conv_bn_forward(x, weight, stride)
    out = jax.block_until_ready(out)

    OH = (H + stride - 1) // stride
    OW = (W + stride - 1) // stride
    assert out.shape == (N, Cout, OH, OW)

    # Check vs a reference using the same bf16 conv operands (isolates kernel-structure
    # errors from operand quantization).  The bf16 conv intermediate adds ~0.4% rel
    # quantization on pre-BN values, so the tolerance is looser than pure-f32.
    ref_bf16 = _reference_conv_bn(
        x.astype(jnp.bfloat16).astype(jnp.float32),
        weight.astype(jnp.bfloat16).astype(jnp.float32), stride)
    err_bf16 = float(jnp.max(jnp.abs(out - ref_bf16)))
    assert err_bf16 < 3e-2, f"mismatch vs bf16-operand reference: {err_bf16}"

    # Loose sanity check vs exact f32 module semantics.
    ref_f32 = _reference_conv_bn(x, weight, stride)
    err_f32 = float(jnp.max(jnp.abs(out - ref_f32)))
    assert err_f32 < 8e-2, f"mismatch vs f32 reference: {err_f32}"

    print("KERNEL_OK")
</pallas_src>

<mosaic_0001>
module attributes {stable_mosaic.version = 11 : i64} {
  func.func @_conv_stats_kernel(%arg0: i32, %arg1: i32, %arg2: i32, %arg3: memref<128x128xbf16, #tpu.memory_space<vmem>>, %arg4: memref<128x128xbf16, #tpu.memory_space<vmem>>, %arg5: memref<128x128xbf16, #tpu.memory_space<vmem>>, %arg6: memref<8x128xf32, #tpu.memory_space<vmem>>, %arg7: memref<8x128xf32, #tpu.memory_space<vmem>>, %arg8: memref<128x128xf32, #tpu.memory_space<vmem>>) attributes {dimension_semantics = [#tpu.dimension_semantics<parallel>, #tpu.dimension_semantics<arbitrary>, #tpu.dimension_semantics<arbitrary>], iteration_bounds = array<i64: 1, 1, 1>, scalar_prefetch = 0 : i64, scratch_operands = 1 : i64, tpu.core_type = #tpu.core_type<tc>, window_params = [{transform_indices = @transform_0, window_bounds = array<i64: 128, 128>}, {transform_indices = @transform_1, window_bounds = array<i64: 128, 128>}, {transform_indices = @transform_2, window_bounds = array<i64: 128, 128>}, {transform_indices = @transform_3, window_bounds = array<i64: 8, 128>}, {transform_indices = @transform_4, window_bounds = array<i64: 8, 128>}]} {
    %c0_i32 = arith.constant 0 : i32
    %0 = arith.cmpi eq, %arg1, %c0_i32 : i32
    %c0_i32_0 = arith.constant 0 : i32
    %1 = arith.cmpi eq, %arg2, %c0_i32_0 : i32
    %2 = arith.andi %0, %1 : i1
    %3 = arith.extui %2 : i1 to i32
    %c0_i32_1 = arith.constant 0 : i32
    %4 = arith.cmpi ne, %3, %c0_i32_1 : i32
    scf.if %4 {
      %cst_13 = arith.constant 0.000000e+00 : f32
      %17 = vector.broadcast %cst_13 : f32 to vector<8x128xf32>
      %c0_14 = arith.constant 0 : index
      %c0_15 = arith.constant 0 : index
      %18 = vector.load %arg6[%c0_14, %c0_15] : memref<8x128xf32, #tpu.memory_space<vmem>>, vector<8x128xf32>
      tpu.vector_store %arg6[%c0_14, %c0_15], %17 {strides = array<i32>} : memref<8x128xf32, #tpu.memory_space<vmem>>, vector<8x128xf32>,
      %cst_16 = arith.constant 0.000000e+00 : f32
      %19 = vector.broadcast %cst_16 : f32 to vector<8x128xf32>
      %c0_17 = arith.constant 0 : index
      %c0_18 = arith.constant 0 : index
      %20 = vector.load %arg7[%c0_17, %c0_18] : memref<8x128xf32, #tpu.memory_space<vmem>>, vector<8x128xf32>
      tpu.vector_store %arg7[%c0_17, %c0_18], %19 {strides = array<i32>} : memref<8x128xf32, #tpu.memory_space<vmem>>, vector<8x128xf32>,
    } else {
    }
    %c0_i32_2 = arith.constant 0 : i32
    %5 = arith.cmpi eq, %arg2, %c0_i32_2 : i32
    %6 = arith.extui %5 : i1 to i32
    %c0_i32_3 = arith.constant 0 : i32
    %7 = arith.cmpi ne, %6, %c0_i32_3 : i32
    scf.if %7 {
      %cst_13 = arith.constant 0.000000e+00 : f32
      %17 = vector.broadcast %cst_13 : f32 to vector<128x128xf32>
      %c0_14 = arith.constant 0 : index
      %c0_15 = arith.constant 0 : index
      %18 = vector.load %arg8[%c0_14, %c0_15] : memref<128x128xf32, #tpu.memory_space<vmem>>, vector<128x128xf32>
      tpu.vector_store %arg8[%c0_14, %c0_15], %17 {strides = array<i32>} : memref<128x128xf32, #tpu.memory_space<vmem>>, vector<128x128xf32>,
    } else {
    }
    %c0 = arith.constant 0 : index
    %c0_4 = arith.constant 0 : index
    %8 = vector.load %arg8[%c0, %c0_4] : memref<128x128xf32, #tpu.memory_space<vmem>>, vector<128x128xf32>
    %c0_5 = arith.constant 0 : index
    %c0_6 = arith.constant 0 : index
    %9 = vector.load %arg3[%c0_5, %c0_6] : memref<128x128xbf16, #tpu.memory_space<vmem>>, vector<128x128xbf16>
    %c0_7 = arith.constant 0 : index
    %c0_8 = arith.constant 0 : index
    %10 = vector.load %arg4[%c0_7, %c0_8] : memref<128x128xbf16, #tpu.memory_space<vmem>>, vector<128x128xbf16>
    %cst = arith.constant dense<0.000000e+00> : vector<128x128xf32>
    %11 = tpu.matmul %9, %10, %cst {dimension_numbers = #tpu.dot_dimension_numbers<[1], [0], [0], [1], [0, 0, 1, 1], [], []>} : vector<128x128xbf16>, vector<128x128xbf16>, vector<128x128xf32> -> vector<128x128xf32>
    %12 = arith.addf %8, %11 : vector<128x128xf32>
    %c0_9 = arith.constant 0 : index
    %c0_10 = arith.constant 0 : index
    %13 = vector.load %arg8[%c0_9, %c0_10] : memref<128x128xf32, #tpu.memory_space<vmem>>, vector<128x128xf32>
    tpu.vector_store %arg8[%c0_9, %c0_10], %12 {strides = array<i32>} : memref<128x128xf32, #tpu.memory_space<vmem>>, vector<128x128xf32>,
    %c0_i32_11 = arith.constant 0 : i32
    %14 = arith.cmpi eq, %arg2, %c0_i32_11 : i32
    %15 = arith.extui %14 : i1 to i32
    %c0_i32_12 = arith.constant 0 : i32
    %16 = arith.cmpi ne, %15, %c0_i32_12 : i32
    scf.if %16 {
      %c0_13 = arith.constant 0 : index
      %c0_14 = arith.constant 0 : index
      %17 = vector.load %arg8[%c0_13, %c0_14] : memref<128x128xf32, #tpu.memory_space<vmem>>, vector<128x128xf32>
      %18 = arith.truncf %17 : vector<128x128xf32> to vector<128x128xbf16>
      %c0_15 = arith.constant 0 : index
      %c0_16 = arith.constant 0 : index
      %19 = vector.load %arg5[%c0_15, %c0_16] : memref<128x128xbf16, #tpu.memory_space<vmem>>, vector<128x128xbf16>
      tpu.vector_store %arg5[%c0_15, %c0_16], %18 {strides = array<i32>} : memref<128x128xbf16, #tpu.memory_space<vmem>>, vector<128x128xbf16>,
      %c0_17 = arith.constant 0 : index
      %c0_18 = arith.constant 0 : index
      %20 = vector.load %arg6[%c0_17, %c0_18] : memref<8x128xf32, #tpu.memory_space<vmem>>, vector<8x128xf32>
      %21 = vector.shape_cast %17 : vector<128x128xf32> to vector<16x8x128xf32>
      %cst_19 = arith.constant dense<0.000000e+00> : vector<8x128xf32>
      %22 = vector.multi_reduction <add>, %21, %cst_19 [0] : vector<16x8x128xf32> to vector<8x128xf32>
      %23 = arith.addf %20, %22 : vector<8x128xf32>
      %c0_20 = arith.constant 0 : index
      %c0_21 = arith.constant 0 : index
      %24 = vector.load %arg6[%c0_20, %c0_21] : memref<8x128xf32, #tpu.memory_space<vmem>>, vector<8x128xf32>
      tpu.vector_store %arg6[%c0_20, %c0_21], %23 {strides = array<i32>} : memref<8x128xf32, #tpu.memory_space<vmem>>, vector<8x128xf32>,
      %c0_22 = arith.constant 0 : index
      %c0_23 = arith.constant 0 : index
      %25 = vector.load %arg7[%c0_22, %c0_23] : memref<8x128xf32, #tpu.memory_space<vmem>>, vector<8x128xf32>
      %26 = arith.mulf %17, %17 : vector<128x128xf32>
      %27 = vector.shape_cast %26 : vector<128x128xf32> to vector<16x8x128xf32>
      %cst_24 = arith.constant dense<0.000000e+00> : vector<8x128xf32>
      %28 = vector.multi_reduction <add>, %27, %cst_24 [0] : vector<16x8x128xf32> to vector<8x128xf32>
      %29 = arith.addf %25, %28 : vector<8x128xf32>
      %c0_25 = arith.constant 0 : index
      %c0_26 = arith.constant 0 : index
      %30 = vector.load %arg7[%c0_25, %c0_26] : memref<8x128xf32, #tpu.memory_space<vmem>>, vector<8x128xf32>
      tpu.vector_store %arg7[%c0_25, %c0_26], %29 {strides = array<i32>} : memref<8x128xf32, #tpu.memory_space<vmem>>, vector<8x128xf32>,
    } else {
    }
    return
  }
  func.func @transform_0(%arg0: i32, %arg1: i32, %arg2: i32) -> (i32, i32) {
    %c1_i32 = arith.constant 1 : i32
    %0 = arith.muli %arg0, %c1_i32 : i32
    %1 = arith.addi %0, %arg1 : i32
    %c0_i32 = arith.constant 0 : i32
    return %1, %arg2 : i32, i32
  }
  func.func @transform_1(%arg0: i32, %arg1: i32, %arg2: i32) -> (i32, i32) {
    %c0_i32 = arith.constant 0 : i32
    %c0_i32_0 = arith.constant 0 : i32
    return %arg2, %c0_i32 : i32, i32
  }
  func.func @transform_2(%arg0: i32, %arg1: i32, %arg2: i32) -> (i32, i32) {
    %c1_i32 = arith.constant 1 : i32
    %0 = arith.muli %arg0, %c1_i32 : i32
    %1 = arith.addi %0, %arg1 : i32
    %c0_i32 = arith.constant 0 : i32
    %c0_i32_0 = arith.constant 0 : i32
    return %1, %c0_i32 : i32, i32
  }
  func.func @transform_3(%arg0: i32, %arg1: i32, %arg2: i32) -> (i32, i32) {
    %c0_i32 = arith.constant 0 : i32
    %c0_i32_0 = arith.constant 0 : i32
    return %arg0, %c0_i32 : i32, i32
  }
  func.func @transform_4(%arg0: i32, %arg1: i32, %arg2: i32) -> (i32, i32) {
    %c0_i32 = arith.constant 0 : i32
    %c0_i32_0 = arith.constant 0 : i32
    return %arg0, %c0_i32 : i32, i32
  }
}

</mosaic_0001>

<bundles_post_ra>
// kernel: tpu_custom_call.1
= control target key start
LH: loop header
LB: loop body
LE: loop exit
PB: predicated region body
PF: predicated region fallthrough
CT: control target
= control target key end

     0   :  { %10 = vsyncpa [#allocation4], 0  ;;  %s821_s0 = inlined_call_operand.hbm [shape: bf16[128,128], index: 0, kind: input, shape index: {}]   ;;  %s822_s1 = inlined_call_operand.hbm [shape: bf16[128,128], index: 1, kind: input, shape index: {}]   ;;  %s823_s2 = inlined_call_operand.hbm [shape: bf16[128,128], index: 2, kind: output, shape index: {0}]   ;;  %s824_s3 = inlined_call_operand.hbm [shape: f32[8,128], index: 3, kind: output, shape index: {1}]   ;;  %s825_s4 = inlined_call_operand.hbm [shape: f32[8,128], index: 4, kind: output, shape index: {2}]  }
   0x1   :  { %11 = vsyncpa [#allocation7], 0 }
   0x2   :  { %12 = vsyncpa [#allocation5], 0 }
   0x3   :  { %13 = vsyncpa [#allocation10], 0  ;;  %s22_s17 = sshll.u32 %s821_s0, 4  ;;  %s753_s18 = smov [#allocation3]   ;;  %s23_s17 = int_to_ptr.hbm [resolvable:$true] %s22_s17 }
   0x4   :  { %s24_s19 = sshll.u32 %s753_s18, 4  ;;  %s35_s22 = sshll.u32 %s822_s1, 4  ;;  %s25_s19 = int_to_ptr.vmem [resolvable:$true] %s24_s19  ;;  %s36_s22 = int_to_ptr.hbm [resolvable:$true] %s35_s22 }
   0x5   :  { %s754_s23 = smov 64   ;;  %s755_s24 = smov 4  }
   0x6   :  { %30 = dma.hbm_to_vmem [thread:$0]  %s23_s17, 1024, %s25_s19, [#allocation4], %s754_s23, %s754_s23, %s755_s24  }
   0x7   :  { %s756_s25 = smov [#allocation6]  }
   0x8   :  { %s37_s26 = sshll.u32 %s756_s25, 4  ;;  %s38_s26 = int_to_ptr.vmem [resolvable:$true] %s37_s26 }
   0x9   :  { %43 = dma.hbm_to_vmem [thread:$0]  %s36_s22, 1024, %s38_s26, [#allocation7], %s754_s23, %s754_s23, %s755_s24  }
   0xa   :  { %745 = dma.done.wait [#allocation4], 1024  }
   0xb   :  { %746 = vsyncadd [#allocation4], 4294966272 }
   0xc   :  { %747 = dma.done.wait [#allocation7], 1024  }
   0xd   :  { %748 = vsyncadd [#allocation7], 4294966272  ;;  %v545_v0 = vld [vmem:[#allocation6 + $0x38] sm:$0xff]  ;;  %v544_v1 = vld [vmem:[#allocation6 + $0x30] sm:$0xff]  ;;  %s757_s0 = smov [#allocation8]   ;;  %s421_s29 = sshll.u32 %s823_s2, 4  ;;  %s422_s29 = int_to_ptr.hbm [resolvable:$true] %s421_s29 }
   0xe   :  { %227 = vmatpush.bf16.msra.mxu0 %v545_v0  ;;  %593 = vmatpush.bf16.msra.mxu1 %v545_v0  ;;  %v543_v2 = vld [vmem:[#allocation6 + $0x28] sm:$0xff]  ;;  %v542_v3 = vld [vmem:[#allocation6 + $0x20] sm:$0xff]  ;;  %v541_v4 = vld [vmem:[#allocation6 + $0x18] sm:$0xff]  ;;  %s419_s1 = sshll.u32 %s757_s0, 4  ;;  %s758_s2 = smov [#allocation9]   ;;  %s420_s1 = int_to_ptr.vmem [resolvable:$true] %s419_s1 }
   0xf   :  { %594 = vmatpush.bf16.msra.mxu2 %v545_v0  ;;  %595 = vmatpush.bf16.msra.mxu3 %v545_v0  ;;  %v540_v5 = vld [vmem:[#allocation6 + $0x10] sm:$0xff]  ;;  %v539_v6 = vld [vmem:[#allocation6 + $0x8] sm:$0xff]  ;;  %v538_v7 = vld [vmem:[#allocation6] sm:$0xff]  ;;  %s433_s30 = sshll.u32 %s758_s2, 4  ;;  %s435_s7 = sshll.u32 %s824_s3, 4  ;;  %s434_s30 = int_to_ptr.vmem [resolvable:$true] %s433_s30  ;;  %s436_s7 = int_to_ptr.hbm [resolvable:$true] %s435_s7 }
  0x10   :  { %v530_v8 = vld [vmem:[#allocation3] sm:$0xff]  ;;  %v532_v9 = vld [vmem:[#allocation3 + $0x10] sm:$0xff]  ;;  %v531_v12 = vld [vmem:[#allocation3 + $0x8] sm:$0xff]  ;;  %s759_s8 = smov [#allocation11]   ;;  %s446_s12 = sshll.u32 %s825_s4, 4  ;;  %s447_s12 = int_to_ptr.hbm [resolvable:$true] %s446_s12 }
  0x11   :  { %v534_v10 = vld [vmem:[#allocation3 + $0x20] sm:$0xff]  ;;  %v536_v11 = vld [vmem:[#allocation3 + $0x30] sm:$0xff]  ;;  %v533_v13 = vld [vmem:[#allocation3 + $0x18] sm:$0xff]  ;;  %s444_s9 = sshll.u32 %s759_s8, 4  ;;  %s445_s9 = int_to_ptr.vmem [resolvable:$true] %s444_s9 }
  0x12   :  { %228 = vmatpush.bf16.msra.mxu0 %v544_v1  ;;  %596 = vmatpush.bf16.msra.mxu1 %v544_v1  ;;  %v535_v14 = vld [vmem:[#allocation3 + $0x28] sm:$0xff]  ;;  %v537_v15 = vld [vmem:[#allocation3 + $0x38] sm:$0xff] }
  0x13   :  { %597 = vmatpush.bf16.msra.mxu2 %v544_v1  ;;  %598 = vmatpush.bf16.msra.mxu3 %v544_v1 }
  0x16   :  { %229 = vmatpush.bf16.msra.mxu0 %v543_v2  ;;  %599 = vmatpush.bf16.msra.mxu1 %v543_v2 }
  0x17   :  { %600 = vmatpush.bf16.msra.mxu2 %v543_v2  ;;  %601 = vmatpush.bf16.msra.mxu3 %v543_v2 }
  0x1a   :  { %230 = vmatpush.bf16.msra.mxu0 %v542_v3  ;;  %602 = vmatpush.bf16.msra.mxu1 %v542_v3 }
  0x1b   :  { %603 = vmatpush.bf16.msra.mxu2 %v542_v3  ;;  %604 = vmatpush.bf16.msra.mxu3 %v542_v3 }
  0x1e   :  { %231 = vmatpush.bf16.msra.mxu0 %v541_v4  ;;  %605 = vmatpush.bf16.msra.mxu1 %v541_v4 }
  0x1f   :  { %606 = vmatpush.bf16.msra.mxu2 %v541_v4  ;;  %607 = vmatpush.bf16.msra.mxu3 %v541_v4 }
  0x22   :  { %232 = vmatpush.bf16.msra.mxu0 %v540_v5  ;;  %608 = vmatpush.bf16.msra.mxu1 %v540_v5 }
  0x23   :  { %609 = vmatpush.bf16.msra.mxu2 %v540_v5  ;;  %610 = vmatpush.bf16.msra.mxu3 %v540_v5 }
  0x26   :  { %233 = vmatpush.bf16.msra.mxu0 %v539_v6  ;;  %611 = vmatpush.bf16.msra.mxu1 %v539_v6 }
  0x27   :  { %612 = vmatpush.bf16.msra.mxu2 %v539_v6  ;;  %613 = vmatpush.bf16.msra.mxu3 %v539_v6 }
  0x2a   :  { %234 = vmatpush.bf16.msra.mxu0 %v538_v7  ;;  %614 = vmatpush.bf16.msra.mxu1 %v538_v7 }
  0x2b   :  { %615 = vmatpush.bf16.msra.mxu2 %v538_v7  ;;  %616 = vmatpush.bf16.msra.mxu3 %v538_v7 }
  0x2d   :  { %235 = vmatmul.bf16.vlgmr.msra.gmra.mxu0 %v530_v8  ;;  %245 = vmatmul.bf16.vlgmr.msra.gmra.mxu1 %v532_v9 }
  0x2e   :  { %255 = vmatmul.bf16.vlgmr.msra.gmra.mxu2 %v534_v10  ;;  %265 = vmatmul.bf16.vlgmr.msra.gmra.mxu3 %v536_v11 }
  0x3d   :  { %240 = vmatmul.bf16.gmra.mxu0 %v531_v12  ;;  %250 = vmatmul.bf16.gmra.mxu1 %v533_v13 }
  0x3e   :  { %260 = vmatmul.bf16.gmra.mxu2 %v535_v14  ;;  %270 = vmatmul.bf16.gmra.mxu3 %v537_v15 }
  0xaa   :  { %v236_v16 = vpop.f32.mrf.mxu0  ;;  %v246_v17 = vpop.f32.mrf.mxu1 }
  0xab   :  { %v378_v31 = vmul.f32 %v236_v16, %v236_v16  ;;  %v382_v45 = vmul.f32 %v246_v17, %v246_v17 }
  0xb1   :  { %v256_v18 = vpop.f32.mrf.mxu2  ;;  %v797_v19 = vpop.f32.mrf.mxu3 }
  0xb2   :  { %v238_v20 = vpop.f32.mrf.mxu0  ;;  %v248_v21 = vpop.f32.mrf.mxu1  ;;  %v386_v61 = vmul.f32 %v256_v18, %v256_v18  ;;  %v390_v9 = vmul.f32 %v797_v19, %v797_v19 }
  0xb3   :  { %v549_v22 = vpack.c.bf16 %v238_v20, %v236_v16  ;;  %v559_v23 = vpack.c.bf16 %v248_v21, %v246_v17  ;;  %v379_v30 = vmul.f32 %v238_v20, %v238_v20  ;;  %v360_v33 = vadd.f32 %v238_v20, %v236_v16 }
  0xb4   :  { %v383_v48 = vmul.f32 %v248_v21, %v248_v21 }
  0xb5   :  { %550 = vst [vmem:[#allocation8] sm:$0xff] %v549_v22   ;;  %v394_v34 = vadd.f32 %v379_v30, %v378_v31 }
  0xb6   :  { %587 = vst [vmem:[#allocation8 + $0x10] sm:$0xff] %v559_v23  }
  0xb9   :  { %v258_v24 = vpop.f32.mrf.mxu2  ;;  %v799_v25 = vpop.f32.mrf.mxu3 }
  0xba   :  { %v241_v26 = vpop.f32.mrf.mxu0  ;;  %v251_v27 = vpop.f32.mrf.mxu1  ;;  %v569_v28 = vpack.c.bf16 %v258_v24, %v256_v18  ;;  %v579_v29 = vpack.c.bf16 %v799_v25, %v797_v19  ;;  %v387_v0 = vmul.f32 %v258_v24, %v258_v24  ;;  %v391_v12 = vmul.f32 %v799_v25, %v799_v25 }
  0xbb   :  { %v380_v32 = vmul.f32 %v241_v26, %v241_v26  ;;  %v361_v35 = vadd.f32 %v360_v33, %v241_v26  ;;  %v384_v51 = vmul.f32 %v251_v27, %v251_v27 }
  0xbc   :  { %589 = vst [vmem:[#allocation8 + $0x20] sm:$0xff] %v569_v28  }
  0xbd   :  { %591 = vst [vmem:[#allocation8 + $0x30] sm:$0xff] %v579_v29   ;;  %v395_v38 = vadd.f32 %v394_v34, %v380_v32 }
  0xc1   :  { %v261_v36 = vpop.f32.mrf.mxu2  ;;  %v271_v37 = vpop.f32.mrf.mxu3 }
  0xc2   :  { %v243_v39 = vpop.f32.mrf.mxu0  ;;  %v253_v40 = vpop.f32.mrf.mxu1  ;;  %v388_v4 = vmul.f32 %v261_v36, %v261_v36  ;;  %v392_v16 = vmul.f32 %v271_v37, %v271_v37 }
  0xc3   :  { %v554_v41 = vpack.c.bf16 %v243_v39, %v241_v26  ;;  %v362_v42 = vadd.f32 %v361_v35, %v243_v39  ;;  %v381_v43 = vmul.f32 %v243_v39, %v243_v39  ;;  %v564_v44 = vpack.c.bf16 %v253_v40, %v251_v27 }
  0xc4   :  { %v385_v59 = vmul.f32 %v253_v40, %v253_v40 }
  0xc5   :  { %586 = vst [vmem:[#allocation8 + $0x8] sm:$0xff] %v554_v41   ;;  %v363_v46 = vadd.f32 %v362_v42, %v246_v17  ;;  %v396_v47 = vadd.f32 %v395_v38, %v381_v43 }
  0xc6   :  { %588 = vst [vmem:[#allocation8 + $0x18] sm:$0xff] %v564_v44  }
  0xc7   :  { %v397_v49 = vadd.f32 %v396_v47, %v382_v45  ;;  %v364_v50 = vadd.f32 %v363_v46, %v248_v21 }
  0xc9   :  { %v365_v52 = vadd.f32 %v364_v50, %v251_v27  ;;  %v398_v53 = vadd.f32 %v397_v49, %v383_v48  ;;  %v263_v54 = vpop.f32.mrf.mxu2  ;;  %v273_v55 = vpop.f32.mrf.mxu3 }
  0xca   :  { %v574_v56 = vpack.c.bf16 %v263_v54, %v261_v36  ;;  %v584_v57 = vpack.c.bf16 %v273_v55, %v271_v37  ;;  %v389_v8 = vmul.f32 %v263_v54, %v263_v54  ;;  %v393_v21 = vmul.f32 %v273_v55, %v273_v55 }
  0xcb   :  { %v366_v58 = vadd.f32 %v365_v52, %v253_v40  ;;  %v399_v60 = vadd.f32 %v398_v53, %v384_v51 }
  0xcc   :  { %590 = vst [vmem:[#allocation8 + $0x28] sm:$0xff] %v574_v56  }
  0xcd   :  { %v367_v62 = vadd.f32 %v366_v58, %v256_v18  ;;  %v400_v63 = vadd.f32 %v399_v60, %v385_v59  ;;  %592 = vst [vmem:[#allocation8 + $0x38] sm:$0xff] %v584_v57  }
  0xce   :  { %427 = dma.vmem_to_hbm [thread:$0]  %s420_s1, 1024, %s422_s29, [#allocation5], %s754_s23, %s754_s23, %s755_s24  }
  0xcf   :  { %v401_v1 = vadd.f32 %v400_v63, %v386_v61  ;;  %v368_v2 = vadd.f32 %v367_v62, %v258_v24 }
  0xd1   :  { %v369_v3 = vadd.f32 %v368_v2, %v261_v36  ;;  %v402_v5 = vadd.f32 %v401_v1, %v387_v0 }
  0xd3   :  { %v403_v6 = vadd.f32 %v402_v5, %v388_v4  ;;  %v370_v7 = vadd.f32 %v369_v3, %v263_v54 }
  0xd5   :  { %v371_v10 = vadd.f32 %v370_v7, %v797_v19  ;;  %v404_v11 = vadd.f32 %v403_v6, %v389_v8 }
  0xd7   :  { %v405_v13 = vadd.f32 %v404_v11, %v390_v9  ;;  %v372_v14 = vadd.f32 %v371_v10, %v799_v25 }
  0xd9   :  { %v373_v15 = vadd.f32 %v372_v14, %v271_v37  ;;  %v406_v17 = vadd.f32 %v405_v13, %v391_v12 }
  0xdb   :  { %v407_v18 = vadd.f32 %v406_v17, %v392_v16  ;;  %v374_v20 = vadd.f32 %v373_v15, %v273_v55 }
  0xdd   :  { %v408_v19 = vadd.f32 %v407_v18, %v393_v21  ;;  %376 = vst [vmem:[#allocation9] sm:$0xff] %v374_v20 }
  0xde   :  { %438 = dma.vmem_to_hbm [thread:$0]  %s434_s30, 128, %s436_s7, [#allocation10]  }
  0xdf   :  { %410 = vst [vmem:[#allocation11] sm:$0xff] %v408_v19 }
  0xe0   :  { %449 = dma.vmem_to_hbm [thread:$0]  %s445_s9, 128, %s447_s12, [#allocation10]  }
  0xe1   :  { %749 = dma.done.wait [#allocation5], 1024  }
  0xe2   :  { %750 = vsyncadd [#allocation5], 4294966272 }
  0xe3   :  { %751 = dma.done.wait [#allocation10], 256  }
  0xe4   :  { %752 = vsyncadd [#allocation10], 4294967040 }
  0xe5   :  { %462 = vsyncpa [#allocation4], 1 }
  0xe6   :  { %463 = vsyncpa [#allocation7], 1 }
  0xe7   :  { %464 = vsyncpa [#allocation5], 1 }
  0xe8   :  { %465 = vsyncpa [#allocation10], 1 }

</bundles_post_ra>
